<compile_context>
chip_gen: v7x
topology: tpu7x:2x2x1
jax: 0.10.0
libtpu: 0.0.40
codegen_flags: <defaults>
</compile_context>

<pallas_src>
import math
import functools

import jax
import jax.numpy as jnp
from jax import lax
from jax.experimental import pallas as pl


def _laplace_kernel(a_ref, b_ref, o_ref, *, eps, frequency, mode, K, G):
    """Writes a lane-dense (R, G*K) slab of the Laplace wavelet filter bank.

    Slab element (r, j) is the tap (channel = r*G + j//K, k = j % K).
    a_ref / b_ref are (R, G) with the same channel packing.
    """
    R, W = o_ref.shape
    half = K // 2

    # Scalar constants folded at trace time.
    w = math.pi * frequency
    c = -0.03 / math.sqrt(1.0 - 0.03 ** 2)
    t_start = -(K / 2.0) + 1.0                     # torch.linspace(-(K/2)+1, -1, K//2)
    t_step = (K / 2.0 - 2.0) / max(half - 1, 1)    # its step (right half has step 1)

    # Hoist the divide out of the (O, K) broadcast: one reciprocal per channel.
    inv_a = 1.0 / (a_ref[...] + eps)               # (R, G) full-precision
    b = b_ref[...]                                 # (R, G)

    # In-kernel time grid: column index -> (lane slot g, tap k).  No t input DMA.
    col = lax.broadcasted_iota(jnp.int32, (R, W), 1)
    inv_a_e = inv_a[:, 0:1]                        # (R, 1): broadcasts over lanes
    b_e = b[:, 0:1]
    k = col
    for g0 in range(1, G):                         # select per K-wide lane slot
        sel = col >= g0 * K
        inv_a_e = jnp.where(sel, inv_a[:, g0:g0 + 1], inv_a_e)
        b_e = jnp.where(sel, b[:, g0:g0 + 1], b_e)
        k = jnp.where(sel, col - g0 * K, k)

    kf = k.astype(jnp.float32)
    # t = concat(linspace(-(K/2)+1, -1, K//2), linspace(0, K/2-1, K//2))[k]
    t = jnp.where(k < half, t_start + kf * t_step, kf - half)

    p = (t - b_e) * inv_a_e                        # (R, W) elementwise on the VPU
    x = w * (p - 0.1)
    cx = c * x

    if mode == "vanilla":
        o_ref[...] = 0.08 * jnp.exp(cx) * (-jnp.sin(x))
    else:  # 'sigmoid'
        sig = 0.5 * (jnp.tanh(0.5 * cx) + 1.0)     # sigmoid(cx): one EUP tanh + FMA
        o_ref[...] = (1.0 / math.e) * jnp.exp(sig) * jnp.sin(x)


def laplace_fast_forward(a_, b_, out_channels, kernel_size, frequency, eps,
                         mode="sigmoid"):
    """Laplace_fast.forward(): returns (out_channels, 1, kernel_size) float32."""
    O, K = int(out_channels), int(kernel_size)
    if K % 2 != 0:
        raise ValueError("kernel_size must be even (the torch module assumes it).")
    if mode not in ("sigmoid", "vanilla"):
        raise ValueError(f"unsupported mode: {mode!r}")

    # Lane-dense packing: put G = 128//K channels side-by-side across the 128
    # lanes so the bank is an (O*K/128, 128) slab (unmasked full-lane stores).
    # Falls back to (O, K) when K does not tile 128 evenly.
    if K % 128 != 0 and 128 % K == 0 and O % (128 // K) == 0:
        G = 128 // K
    else:
        G = 1
    R, W = O // G, G * K

    a_rg = jnp.asarray(a_, jnp.float32).reshape(R, G)
    b_rg = jnp.asarray(b_, jnp.float32).reshape(R, G)

    kernel = functools.partial(_laplace_kernel, eps=float(eps),
                               frequency=float(frequency), mode=mode, K=K, G=G)

    # Single tile, no grid: whole-array blocks in VMEM (default specs).  The
    # whole problem is a few KiB, so grid pipelining would only add overhead.
    out = pl.pallas_call(
        kernel,
        out_shape=jax.ShapeDtypeStruct((R, W), jnp.float32),
    )(a_rg, b_rg)

    # Row-major (R, G*K) is exactly channel-major (O, K): the reshape is free.
    return out.reshape(O, 1, K)


def _reference(a_, b_, out_channels, kernel_size, frequency, eps, mode="sigmoid"):
    """Pure-JAX reference mirroring the PyTorch forward literally."""
    O, K = int(out_channels), int(kernel_size)
    half = K // 2
    time_left = jnp.linspace(-(K / 2) + 1.0, -1.0, half, dtype=jnp.float32)
    time_right = jnp.linspace(0.0, K / 2 - 1.0, half, dtype=jnp.float32)
    a2 = jnp.asarray(a_, jnp.float32).reshape(O, 1)
    b2 = jnp.asarray(b_, jnp.float32).reshape(O, 1)
    w = math.pi * frequency
    c = -0.03 / math.sqrt(1.0 - 0.03 ** 2)

    def lap(p):
        x = w * (p - 0.1)
        if mode == "vanilla":
            return 0.08 * jnp.exp(c * x) * (-jnp.sin(x))
        return (1.0 / math.e) * jnp.exp(jax.nn.sigmoid(c * x)) * jnp.sin(x)

    p1 = (time_left[None, :] - b2) / (a2 + eps)
    p2 = (time_right[None, :] - b2) / (a2 + eps)
    return jnp.concatenate([lap(p1), lap(p2)], axis=1).reshape(O, 1, K)


if __name__ == "__main__":
    # Small configuration consistent with the module.  forward() takes no
    # external tensor input; the parameters are deterministic in __init__:
    #   a_ = b_ = linspace(0, out_channels, out_channels)
    # frequency/eps are constructor hyperparameters; moderate values are chosen
    # so |pi*frequency*(p-0.1)| stays ~1e2 and the f32 kernel-vs-XLA comparison
    # is well-conditioned (sin of ~1e3+ arguments is not meaningfully
    # comparable across backends in f32).
    out_channels = 16
    kernel_size = 64
    frequency = 1.0
    eps = 1.0

    _ = jax.random.PRNGKey(0)  # kept for protocol; params are deterministic
    a_ = jnp.linspace(0.0, float(out_channels), out_channels, dtype=jnp.float32)
    b_ = jnp.linspace(0.0, float(out_channels), out_channels, dtype=jnp.float32)

    for mode in ("sigmoid", "vanilla"):
        out = laplace_fast_forward(a_, b_, out_channels, kernel_size, frequency,
                                   eps, mode)
        out = jax.block_until_ready(out)
        ref = _reference(a_, b_, out_channels, kernel_size, frequency, eps, mode)
        assert out.shape == (out_channels, 1, kernel_size)
        # Tolerance sized for f32 transcendental-implementation differences
        # (Mosaic EUP/VPU sin/exp/tanh vs XLA) at |x| <= ~1e2.
        err = float(jnp.max(jnp.abs(out - ref)))
        assert jnp.allclose(out, ref, atol=1e-3, rtol=1e-3), (mode, err)

    print("KERNEL_OK")
</pallas_src>

<mosaic_0001>
module attributes {stable_mosaic.version = 11 : i64} {
  func.func @_laplace_kernel(%arg0: memref<8x2xf32, #tpu.memory_space<vmem>>, %arg1: memref<8x2xf32, #tpu.memory_space<vmem>>, %arg2: memref<8x128xf32, #tpu.memory_space<vmem>>) attributes {dimension_semantics = [], scalar_prefetch = 0 : i64, scratch_operands = 0 : i64, tpu.core_type = #tpu.core_type<tc>} {
    %c0 = arith.constant 0 : index
    %c0_0 = arith.constant 0 : index
    %0 = vector.load %arg0[%c0, %c0_0] : memref<8x2xf32, #tpu.memory_space<vmem>>, vector<8x2xf32>
    %cst = arith.constant 1.000000e+00 : f32
    %1 = vector.broadcast %cst : f32 to vector<8x2xf32>
    %2 = arith.addf %0, %1 : vector<8x2xf32>
    %cst_1 = arith.constant 1.000000e+00 : f32
    %3 = vector.broadcast %cst_1 : f32 to vector<8x2xf32>
    %4 = arith.divf %3, %2 : vector<8x2xf32>
    %c0_2 = arith.constant 0 : index
    %c0_3 = arith.constant 0 : index
    %5 = vector.load %arg1[%c0_2, %c0_3] : memref<8x2xf32, #tpu.memory_space<vmem>>, vector<8x2xf32>
    %6 = tpu.iota {dimensions = array<i32: 1>} : vector<8x128xi32>
    %7 = vector.extract_strided_slice %4 {offsets = [0, 0], sizes = [8, 1], strides = [1, 1]} : vector<8x2xf32> to vector<8x1xf32>
    %8 = vector.extract_strided_slice %5 {offsets = [0, 0], sizes = [8, 1], strides = [1, 1]} : vector<8x2xf32> to vector<8x1xf32>
    %c64_i32 = arith.constant 64 : i32
    %9 = vector.broadcast %c64_i32 : i32 to vector<8x128xi32>
    %10 = arith.cmpi sge, %6, %9 : vector<8x128xi32>
    %11 = vector.extract_strided_slice %4 {offsets = [0, 1], sizes = [8, 1], strides = [1, 1]} : vector<8x2xf32> to vector<8x1xf32>
    %12 = vector.shape_cast %11 : vector<8x1xf32> to vector<8x1xf32>
    %13 = vector.broadcast %12 : vector<8x1xf32> to vector<8x128xf32>
    %14 = vector.shape_cast %7 : vector<8x1xf32> to vector<8x1xf32>
    %15 = vector.broadcast %14 : vector<8x1xf32> to vector<8x128xf32>
    %16 = arith.select %10, %13, %15 : vector<8x128xi1>, vector<8x128xf32>
    %17 = vector.extract_strided_slice %5 {offsets = [0, 1], sizes = [8, 1], strides = [1, 1]} : vector<8x2xf32> to vector<8x1xf32>
    %18 = vector.shape_cast %17 : vector<8x1xf32> to vector<8x1xf32>
    %19 = vector.broadcast %18 : vector<8x1xf32> to vector<8x128xf32>
    %20 = vector.shape_cast %8 : vector<8x1xf32> to vector<8x1xf32>
    %21 = vector.broadcast %20 : vector<8x1xf32> to vector<8x128xf32>
    %22 = arith.select %10, %19, %21 : vector<8x128xi1>, vector<8x128xf32>
    %c64_i32_4 = arith.constant 64 : i32
    %23 = vector.broadcast %c64_i32_4 : i32 to vector<8x128xi32>
    %24 = arith.subi %6, %23 : vector<8x128xi32>
    %25 = arith.select %10, %24, %6 : vector<8x128xi1>, vector<8x128xi32>
    %26 = arith.sitofp %25 : vector<8x128xi32> to vector<8x128xf32>
    %c32_i32 = arith.constant 32 : i32
    %27 = vector.broadcast %c32_i32 : i32 to vector<8x128xi32>
    %28 = arith.cmpi slt, %25, %27 : vector<8x128xi32>
    %cst_5 = arith.constant 0.967741906 : f32
    %29 = vector.broadcast %cst_5 : f32 to vector<8x128xf32>
    %30 = arith.mulf %26, %29 : vector<8x128xf32>
    %cst_6 = arith.constant -3.100000e+01 : f32
    %31 = vector.broadcast %cst_6 : f32 to vector<8x128xf32>
    %32 = arith.addf %31, %30 : vector<8x128xf32>
    %cst_7 = arith.constant 3.200000e+01 : f32
    %33 = vector.broadcast %cst_7 : f32 to vector<8x128xf32>
    %34 = arith.subf %26, %33 : vector<8x128xf32>
    %35 = arith.select %28, %32, %34 : vector<8x128xi1>, vector<8x128xf32>
    %36 = arith.subf %35, %22 : vector<8x128xf32>
    %37 = arith.mulf %36, %16 : vector<8x128xf32>
    %cst_8 = arith.constant 1.000000e-01 : f32
    %38 = vector.broadcast %cst_8 : f32 to vector<8x128xf32>
    %39 = arith.subf %37, %38 : vector<8x128xf32>
    %cst_9 = arith.constant 3.14159274 : f32
    %40 = vector.broadcast %cst_9 : f32 to vector<8x128xf32>
    %41 = arith.mulf %40, %39 : vector<8x128xf32>
    %cst_10 = arith.constant -0.0300135091 : f32
    %42 = vector.broadcast %cst_10 : f32 to vector<8x128xf32>
    %43 = arith.mulf %42, %41 : vector<8x128xf32>
    %cst_11 = arith.constant 5.000000e-01 : f32
    %44 = vector.broadcast %cst_11 : f32 to vector<8x128xf32>
    %45 = arith.mulf %44, %43 : vector<8x128xf32>
    %46 = math.tanh %45 : vector<8x128xf32>
    %cst_12 = arith.constant 1.000000e+00 : f32
    %47 = vector.broadcast %cst_12 : f32 to vector<8x128xf32>
    %48 = arith.addf %46, %47 : vector<8x128xf32>
    %cst_13 = arith.constant 5.000000e-01 : f32
    %49 = vector.broadcast %cst_13 : f32 to vector<8x128xf32>
    %50 = arith.mulf %49, %48 : vector<8x128xf32>
    %51 = math.exp %50 : vector<8x128xf32>
    %cst_14 = arith.constant 0.36787945 : f32
    %52 = vector.broadcast %cst_14 : f32 to vector<8x128xf32>
    %53 = arith.mulf %52, %51 : vector<8x128xf32>
    %54 = math.sin %41 : vector<8x128xf32>
    %55 = arith.mulf %53, %54 : vector<8x128xf32>
    %c0_15 = arith.constant 0 : index
    %c0_16 = arith.constant 0 : index
    %56 = vector.load %arg2[%c0_15, %c0_16] : memref<8x128xf32, #tpu.memory_space<vmem>>, vector<8x128xf32>
    tpu.vector_store %arg2[%c0_15, %c0_16], %55 {strides = array<i32>} : memref<8x128xf32, #tpu.memory_space<vmem>>, vector<8x128xf32>,
    return
  }
}

</mosaic_0001>

<bundles_post_ra>
// kernel: tpu_custom_call.1
= control target key start
LH: loop header
LB: loop body
LE: loop exit
PB: predicated region body
PF: predicated region fallthrough
CT: control target
= control target key end

     0   :  { %s302_s0 = inlined_call_operand.vmem [shape: f32[8,2], index: 0, kind: input, shape index: {}]   ;;  %s303_s1 = inlined_call_operand.vmem [shape: f32[8,2], index: 1, kind: input, shape index: {}]   ;;  %s304_s2 = inlined_call_operand.hbm [shape: f32[8,128], index: 2, kind: output, shape index: {}]  }
   0x1   :  { %v16_v0 = vld [vmem:[%s303_s1] sm:$0xff] }
   0x2   :  { %v12_v1 = vld [vmem:[%s302_s0] sm:$0xff] }
   0x3   :  { %7 = vsyncpa [#allocation3], 0  ;;  %v238_v2 = vmov 1   ;;  %v13_v3 = vadd.f32 1.0, %v12_v1  ;;  %v239_v4 = vmov 0   ;;  %v17_v6 = vlaneseq  ;;  %s246_s0 = smov [#allocation2]  }
   0x4   :  { %200 = vset.pattern.permute.xlu0 %v238_v2  ;;  %202 = vset.pattern.permute.xlu1 %v238_v2  ;;  %v240_v35 = vmov 683565275   ;;  %v241_v37 = vmov 2475754826   ;;  %v242_v40 = vmov 2131351028  }
   0x5   :  { %32 = vperm.xlu0 %200, %v16_v0   ;;  %204 = vrcp.f32 %v13_v3  ;;  %v18_v7 = vand.u32 127, %v17_v6  ;;  %v243_v43 = vmov 2102212464   ;;  %v244_v46 = vmov 920167782   ;;  %s172_s1 = sshll.u32 %s246_s0, 4  ;;  %s173_s1 = int_to_ptr.vmem [resolvable:$true] %s172_s1 }
   0x6   :  { %v245_v49 = vmov 1326507024   ;;  %s214_s13 = scalar_lea.vmem %s173_s1, 128  ;;  %p219_p1 = scmp.lt.s32.totalorder %s173_s1, %s173_s1 }
   0x7   :  { %v180_v8 = vadd.s32 4294967232, %v18_v7  ;;  %vm19_vm0 = vcmp.ge.s32.totalorder %v18_v7, 64  ;;  %p215_p0 = scmp.ne.s32.totalorder %s173_s1, %s214_s13  ;;  %p220_p2 = scmp.lt.s32.totalorder %s214_s13, %s214_s13 }
   0x9   :  { %201 = vset.pattern.permute.xlu0 %v239_v4  ;;  %v41_v9 = vsel %vm19_vm0, %v180_v8, %v18_v7  ;;  %p221_p3 = por %p220_p2, %p219_p1 }
   0xa   :  { %36 = vperm.xlu0 %201, %v16_v0   ;;  %v42_v10 = vcvt.s32.f32 %v41_v9  ;;  %vm43_vm1 = vcmp.lt.s32.totalorder %v41_v9, 32 }
   0xb   :  { %p222_p4 = pnand %p221_p3, %p215_p0 }
   0xc   :  { %v44_v12 = vmul.f32 0.9677419, %v42_v10  ;;  %v181_v14 = vadd.f32 -32.0, %v42_v10 }
   0xe   :  { %v45_v13 = vadd.f32 -31.0, %v44_v12 }
   0xf   :  { %v205_v5 = vpop.eup %204 }
  0x10   :  { %22 = vperm.xlu1 %202, %v205_v5   ;;  %v47_v17 = vsel %vm43_vm1, %v45_v13, %v181_v14 }
  0x14   :  { %203 = vset.pattern.permute.xlu1 %v239_v4 }
  0x15   :  { %26 = vperm.xlu1 %203, %v205_v5  }
  0x84   :  { %v33_v11 = vpop.permute.xlu0 %32 }
  0x89   :  { %v37_v15 = vpop.permute.xlu0 %36 }
  0x8a   :  { %v39_v18 = vsel %vm19_vm0, %v33_v11, %v37_v15 }
  0x8b   :  { %v48_v19 = vsub.f32 %v47_v17, %v39_v18 }
  0x8f   :  { %v23_v16 = vpop.permute.xlu1 %22 }
  0x94   :  { %v27_v20 = vpop.permute.xlu1 %26 }
  0x95   :  { %v29_v21 = vsel %vm19_vm0, %v23_v16, %v27_v20 }
  0x96   :  { %v49_v22 = vmul.f32 %v48_v19, %v29_v21 }
  0x98   :  { %v182_v23 = vadd.f32 -0.1, %v49_v22 }
  0x9a   :  { %v268_v24 = vmul.f32 3.1415927, %v182_v23 }
  0x9c   :  { %v63_v25 = vand.u32 2139095040, %v268_v24  ;;  %v60_v29 = vand.u32 2147483647, %v268_v24  ;;  %v52_v17 = vmul.f32 -0.03001351, %v268_v24  ;;  %vm62_vm9 = vcmp.lt.s32.totalorder %v268_v24, 0 }
  0x9d   :  { %vm152_vm14 = vweird.f32 %v268_v24 }
  0x9e   :  { %v64_v26 = vshrl.u32 %v63_v25, 23  ;;  %v67_v33 = vand.u32 8388607, %v60_v29  ;;  %v53_v20 = vmul.f32 0.5, %v52_v17  ;;  %vm61_vm10 = vcmp.le.f32.partialorder %v60_v29, 0.7853982 }
  0xa0   :  { %v183_v27 = vadd.s32 4294967169, %v64_v26  ;;  %v68_v51 = vor.u32 8388608, %v67_v33  ;;  %206 = vtanh.f32 %v53_v20 }
  0xa2   :  { %v70_v28 = vadd.s32 1, %v183_v27  ;;  %v108_v1 = vshll.u32 %v68_v51, 8 }
  0xa4   :  { %vm71_vm2 = vcmp.gt.s32.totalorder %v70_v28, 0 }
  0xa5   :  { %v72_v30 = vsel %vm71_vm2, %v70_v28, 0 }
  0xa6   :  { %v74_v31 = vand.u32 31, %v72_v30  ;;  %v73_v34 = vshrl.u32 %v72_v30, 5 }
  0xa8   :  { %v75_v32 = vsub.s32 32, %v74_v31  ;;  %v77_v36 = vshll.u32 %v240_v35, %v74_v31  ;;  %v80_v38 = vshll.u32 %v241_v37, %v74_v31  ;;  %v83_v42 = vshll.u32 %v242_v40, %v74_v31 }
  0xa9   :  { %v86_v45 = vshll.u32 %v243_v43, %v74_v31  ;;  %v89_v48 = vshll.u32 %v244_v46, %v74_v31  ;;  %vm92_vm3 = vcmp.lt.s32.totalorder %v73_v34, 1  ;;  %vm95_vm4 = vcmp.lt.s32.totalorder %v73_v34, 4 }
  0xaa   :  { %v78_v39 = vshrl.u32 %v241_v37, %v75_v32  ;;  %v81_v41 = vshrl.u32 %v242_v40, %v75_v32  ;;  %v84_v44 = vshrl.u32 %v243_v43, %v75_v32  ;;  %v87_v47 = vshrl.u32 %v244_v46, %v75_v32 }
  0xab   :  { %v90_v50 = vshrl.u32 %v245_v49, %v75_v32  ;;  %v76_v60 = vshrl.u32 %v240_v35, %v75_v32  ;;  %vm94_vm5 = vcmp.lt.s32.totalorder %v73_v34, 3  ;;  %vm93_vm6 = vcmp.lt.s32.totalorder %v73_v34, 2  ;;  %v207_v34 = vpop.eup %206 }
  0xac   :  { %v79_v52 = vor.u32 %v78_v39, %v77_v36  ;;  %v82_v53 = vor.u32 %v81_v41, %v80_v38  ;;  %v85_v54 = vor.u32 %v84_v44, %v83_v42  ;;  %v88_v55 = vor.u32 %v87_v47, %v86_v45 }
  0xad   :  { %v91_v56 = vor.u32 %v90_v50, %v89_v48  ;;  %v55_v37 = vadd.f32 1.0, %v207_v34 }
  0xae   :  { %v97_v57 = vsel %vm95_vm4, %v85_v54, 2102212464  ;;  %v100_v58 = vsel %vm92_vm3, %v79_v52, %v82_v53  ;;  %v104_v59 = vsel %vm92_vm3, %v82_v53, %v85_v54  ;;  %v101_v61 = vsel %vm95_vm4, %v88_v55, 920167782 }
  0xaf   :  { %v105_v62 = vsel %vm95_vm4, %v91_v56, 1326507024  ;;  %v102_v63 = vsel %vm94_vm5, %v85_v54, %v101_v61  ;;  %v96_v2 = vsel %vm92_vm3, %v76_v60, %v79_v52  ;;  %v98_v3 = vsel %vm94_vm5, %v82_v53, %v97_v57 }
  0xb0   :  { %v106_v0 = vsel %vm94_vm5, %v88_v55, %v105_v62  ;;  %v103_v4 = vsel %vm93_vm6, %v100_v58, %v102_v63  ;;  %v99_v10 = vsel %vm93_vm6, %v96_v2, %v98_v3  ;;  %v56_v41 = vmul.f32 0.5, %v55_v37 }
  0xb1   :  { %v107_v5 = vsel %vm93_vm6, %v104_v59, %v106_v0  ;;  %v277_v8 = vmul.u32.u64.low %v108_v1, %v103_v4  ;;  %v278_v9 = vmul.u32.u64.high %v108_v1, %v103_v4, %v277_v8  ;;  %v115_v12 = vmul.u32 %v108_v1, %v99_v10 }
  0xb2   :  { %v274_v6 = vmul.u32.u64.low %v108_v1, %v107_v5  ;;  %v275_v7 = vmul.u32.u64.high %v108_v1, %v107_v5, %v274_v6  ;;  %v57_v45 = vmul.f32 1.442695, %v56_v41 }
  0xb3   :  { %v118_v11 = vadd.s32 1, %v278_v9 }
  0xb4   :  { %vm117_vm7 = vc.u32 %v275_v7, %v277_v8  ;;  %v116_v27 = vadd.s32 %v277_v8, %v275_v7 }
  0xb5   :  { %v119_v13 = vsel %vm117_vm7, %v118_v11, %v278_v9 }
  0xb6   :  { %v120_v14 = vadd.s32 %v119_v13, %v115_v12 }
  0xb8   :  { %v121_v15 = vadd.s32 536870912, %v120_v14 }
  0xba   :  { %v122_v16 = vshrl.u32 %v121_v15, 30 }
  0xbc   :  { %v123_v18 = vshll.u32 %v122_v16, 30  ;;  %v146_v43 = vsub.s32 4, %v122_v16 }
  0xbe   :  { %v124_v19 = vsub.s32 %v120_v14, %v123_v18  ;;  %v147_v47 = vsel %vm62_vm9, %v146_v43, %v122_v16 }
  0xbf   :  { %v149_v49 = vsel %vm61_vm10, 0, %v147_v47 }
  0xc0   :  { %v126_v21 = vsub.s32 0, %v124_v19  ;;  %v153_v50 = vadd.s32 3, %v149_v49 }
  0xc2   :  { %v184_v22 = vmin.u32 %v126_v21, %v124_v19  ;;  %v154_v51 = vand.u32 3, %v153_v50 }
  0xc4   :  { %v128_v23 = vclz %v184_v22  ;;  %vm159_vm11 = vcmp.eq.s32.totalorder %v154_v51, 2  ;;  %vm156_vm12 = vcmp.eq.s32.totalorder %v154_v51, 0  ;;  %vm155_vm13 = vcmp.lt.s32.totalorder %v154_v51, 2 }
  0xc6   :  { %v185_v25 = vadd.s32 4294967294, %v128_v23 }
  0xc8   :  { %vm186_vm8 = vcmp.lt.s32.totalorder %v185_v25, 0 }
  0xc9   :  { %v131_v26 = vsel %vm186_vm8, 0, %v185_v25 }
  0xca   :  { %v132_v28 = vsub.s32 32, %v131_v26  ;;  %v136_v30 = vsub.s32 4294967266, %v131_v26  ;;  %v133_v31 = vshll.u32 %v124_v19, %v131_v26 }
  0xcc   :  { %v134_v32 = vshrl.u32 %v116_v27, %v132_v28  ;;  %v137_v33 = vadd.s32 127, %v136_v30 }
  0xce   :  { %v135_v35 = vor.u32 %v134_v32, %v133_v31  ;;  %v138_v36 = vshll.u32 %v137_v33, 23 }
  0xd0   :  { %v139_v38 = vor.u32 4788187, %v138_v36  ;;  %v142_v40 = vcvt.s32.f32 %v135_v35 }
  0xd2   :  { %v140_v39 = vand.u32 2147483647, %v139_v38 }
  0xd4   :  { %v143_v42 = vmul.f32 %v142_v40, %v140_v39 }
  0xd6   :  { %v144_v44 = vxor.u32 2147483648, %v143_v42 }
  0xd8   :  { %v145_v46 = vsel %vm62_vm9, %v144_v44, %v143_v42 }
  0xd9   :  { %v148_v48 = vsel %vm61_vm10, %v268_v24, %v145_v46 }
  0xda   :  { %208 = vcosq.f32 %v148_v48 }
  0xdb   :  { %210 = vsinq.f32 %v148_v48 }
  0xdc   :  { %212 = vpow2.f32 %v57_v45 }
  0xe4   :  { %v209_v52 = vpop.eup %208 }
  0xe5   :  { %v211_v53 = vpop.eup %210  ;;  %v160_v54 = vxor.u32 2147483648, %v209_v52 }
  0xe6   :  { %v213_v55 = vpop.eup %212  ;;  %v157_v56 = vxor.u32 2147483648, %v211_v53 }
  0xe7   :  { %v161_v57 = vsel %vm159_vm11, %v160_v54, %v211_v53  ;;  %v59_v58 = vmul.f32 0.36787945, %v213_v55 }
  0xe8   :  { %v158_v29 = vsel %vm156_vm12, %v209_v52, %v157_v56 }
  0xe9   :  { %v162_v59 = vsel %vm155_vm13, %v158_v29, %v161_v57 }
  0xea   :  { %v163_v60 = vsel %vm152_vm14, nan, %v162_v59 }
  0xeb   :  { %v164_v61 = vmul.f32 %v163_v60, %v59_v58 }
  0xed   :  { %165 = vst [vmem:[#allocation2] sm:$0xff] %v164_v61 }
  0xee   :  { %225 = shalt.err (!%p222_p4)
}
  0xef   :  { %s226_s16 = scalar_lea.hbm %s304_s2, 128 }
  0xf0   :  { %p227_p5 = scmp.ne.s32.totalorder %s304_s2, %s226_s16  ;;  %p230_p6 = scmp.lt.u32.totalorder %s226_s16, %s304_s2 }
  0xf2   :  { %p232_p7 = pnand %p230_p6, %p227_p5 }
  0xf4   :  { %235 = shalt.err (!%p232_p7)
}
  0xf5   :  { %175 = dma.vmem_to_hbm [thread:$0]  %s173_s1, 128, %s304_s2, [#allocation3]  }
  0xf6   :  { %236 = dma.done.wait [#allocation3], 128  }
  0xf7   :  { %237 = vsyncadd [#allocation3], 4294967168 }
  0xf8   :  { %179 = vsyncpa [#allocation3], 1 }

</bundles_post_ra>
